<compile_context>
chip_gen: v7x
topology: tpu7x:2x2x1
jax: 0.10.0
libtpu: 0.0.40
codegen_flags: <defaults>
</compile_context>

<pallas_src>
import math
from itertools import combinations

import numpy as np
import jax
import jax.numpy as jnp
from jax.experimental import pallas as pl
from jax.experimental.pallas import tpu as pltpu


# ---------------------------------------------------------------------------
# Small helpers.
# ---------------------------------------------------------------------------
def _cdiv(a, b):
    return -(-a // b)


def _round_up(a, b):
    return _cdiv(a, b) * b


def _device_kind():
    try:
        return jax.devices()[0].device_kind.lower()
    except Exception:
        return ""


def _is_v5e():
    k = _device_kind()
    return ("v5 lite" in k) or ("v5e" in k) or ("v5lite" in k)


def _default_mxu_target():
    return 128 if _is_v5e() else 256


def _default_batch_tile():
    return 128 if _is_v5e() else 256


def _pick_gblk(h, n_groups, *, lane=128, target=None):
    """Groups packed per chunk so that gblk*H is a multiple of 128, ~target."""
    if target is None:
        target = _default_mxu_target()
    base = lane // math.gcd(h, lane)
    k = max(1, target // max(1, base * h))
    gblk = base * k
    gblk = min(gblk, base * _cdiv(max(n_groups, 1), base))
    gt = _cdiv(max(n_groups, 1), gblk)
    return gblk, gt


def _block_diag(w, gblk):
    """[Gp, a, b] per-group weights -> [Gt, gblk*a, gblk*b] block-diagonal."""
    gp, a, b = w.shape
    gt = gp // gblk
    wr = w.reshape(gt, gblk, a, b)
    eye = jnp.eye(gblk, dtype=w.dtype)
    out = jnp.einsum("tgij,gk->tgikj", wr, eye)     # zero off-diagonal blocks
    return out.reshape(gt, gblk * a, gblk * b)


def smooth_z(z, gamma):
    smooth = -2.0 / gamma ** 3 * z ** 3 + 3.0 / (2.0 * gamma) * z + 0.5
    return jnp.where(z <= -gamma / 2.0, jnp.zeros_like(z),
                     jnp.where(z >= gamma / 2.0, jnp.ones_like(z), smooth))


# ---------------------------------------------------------------------------
# Pallas kernel: fused main+pair group MLP (layers 1..2), MXU-packed.
#   grid = (batch tiles [parallel], group chunks [arbitrary, reduction])
# ---------------------------------------------------------------------------
def _packed_group_mlp_kernel(x_ref, w1_ref, b1_ref, w2_ref, out_ref):
    j = pl.program_id(1)                       # group-chunk (reduction) axis

    @pl.when(j == 0)
    def _init():
        out_ref[...] = jnp.zeros_like(out_ref)

    x = x_ref[...]                             # [BT, GH]   compute dtype
    h = jnp.dot(x, w1_ref[0], preferred_element_type=jnp.float32)
    h = jnp.maximum(h + b1_ref[0], 0.0).astype(x.dtype)
    # z-gating, the sum over groups and the O->128 lane pad are folded into w2.
    out_ref[...] += jnp.dot(h, w2_ref[0], preferred_element_type=jnp.float32)


def _group_mlp_fused(x, w1bd, b1p, w2z, *, b_tile=None):
    """x: [B, gt*GH] lane-major hidden states; returns [B, O_pad] f32."""
    B = x.shape[0]
    gt, GH, O_pad = w2z.shape

    if b_tile is None:
        b_tile = min(_default_batch_tile(), _round_up(B, 16))
    B_pad = _round_up(B, b_tile)
    if B_pad != B:
        x = jnp.pad(x, ((0, B_pad - B), (0, 0)))
    nb = B_pad // b_tile

    out = pl.pallas_call(
        _packed_group_mlp_kernel,
        out_shape=jax.ShapeDtypeStruct((B_pad, O_pad), jnp.float32),
        grid_spec=pltpu.PrefetchScalarGridSpec(
            num_scalar_prefetch=0,
            grid=(nb, gt),
            in_specs=[
                pl.BlockSpec((b_tile, GH), lambda b, j: (b, j)),      # x chunk
                pl.BlockSpec((1, GH, GH), lambda b, j: (j, 0, 0)),    # W1 blkdiag
                pl.BlockSpec((1, 1, GH), lambda b, j: (j, 0, 0)),     # b1
                pl.BlockSpec((1, GH, O_pad), lambda b, j: (j, 0, 0)),  # z*W2 (padded)
            ],
            out_specs=pl.BlockSpec((b_tile, O_pad), lambda b, j: (b, 0)),
        ),
        compiler_params=pltpu.CompilerParams(
            dimension_semantics=("parallel", "arbitrary"),
            vmem_limit_bytes=32 * 1024 * 1024),
    )(x, w1bd, b1p, w2z)
    return out[:B]


# ---------------------------------------------------------------------------
# One-time parameter packing (cache the result; do NOT call per forward).
# ---------------------------------------------------------------------------
def prepare_dnamite_params(params, feature_sizes, *, gamma=1.0,
                           compute_dtype=jnp.bfloat16, lane=128,
                           mxu_target=None):
    f32 = jnp.float32
    feature_sizes = np.asarray(feature_sizes, np.int64)
    F = feature_sizes.shape[0]
    pairs_list = np.asarray(params["pairs_list"])            # [P, 2]
    P = pairs_list.shape[0]
    E = params["embedding"].shape[1]
    H = params["main_w0"].shape[2]
    O = params["main_w2"].shape[2]

    emb = params["embedding"].astype(f32)
    feat_offsets_np = np.concatenate([[0], np.cumsum(feature_sizes)[:-1]])

    # ---- fold layer 0 (W0, b0, ReLU) into gather tables (kernel_size == 0) ----
    feat_of_row = np.repeat(np.arange(F), feature_sizes)      # [total]
    w0_rows = params["main_w0"].astype(f32)[feat_of_row]      # [total, E, H]
    b0_rows = params["main_b0"].astype(f32)[feat_of_row]      # [total, H]
    table_main = jnp.maximum(
        jnp.einsum("te,teh->th", emb, w0_rows) + b0_rows, 0.0)  # [total, H]

    # compact per-(pair, member) layer-0 partial pre-activations
    sizes_pm = feature_sizes[pairs_list]                      # [P, 2]
    pm_offsets = np.zeros((P, 2), np.int64)
    pm_offsets.flat[1:] = np.cumsum(sizes_pm.reshape(-1))[:-1]
    row_to_emb = np.concatenate(
        [np.arange(feat_offsets_np[f], feat_offsets_np[f] + feature_sizes[f])
         for f in pairs_list.reshape(-1)])
    row_to_pm = np.repeat(np.arange(2 * P), sizes_pm.reshape(-1))
    w0_halves = params["pair_w0"].astype(f32).reshape(P, 2, E, H).reshape(2 * P, E, H)
    part_table = jnp.einsum("re,reh->rh",
                            emb[row_to_emb], w0_halves[row_to_pm])   # [R, H]

    # ---- pack layers 1..2 over all groups (mains then pairs) -----------------
    G = F + P
    w1_all = jnp.concatenate([params["main_w1"], params["pair_w1"]], 0).astype(f32)
    b1_all = jnp.concatenate([params["main_b1"], params["pair_b1"]], 0).astype(f32)
    w2_all = jnp.concatenate([params["main_w2"], params["pair_w2"]], 0).astype(f32)
    b2_all = jnp.concatenate([params["main_b2"], params["pair_b2"]], 0).astype(f32)
    z_all = jnp.concatenate([smooth_z(params["z_main"].astype(f32), gamma),
                             smooth_z(params["z_pairs"].astype(f32), gamma)])

    gblk, gt = _pick_gblk(H, G, lane=lane, target=mxu_target)
    gp = gt * gblk

    def padg(a):
        if gp == G:
            return a
        return jnp.pad(a, [(0, gp - G)] + [(0, 0)] * (a.ndim - 1))

    w1p, b1p_, w2p, zp = padg(w1_all), padg(b1_all), padg(w2_all), padg(z_all)

    GH = gblk * H
    O_pad = _round_up(max(O, 1), lane)
    w1bd = _block_diag(w1p, gblk).astype(compute_dtype)        # [gt, GH, GH]
    b1pk = b1p_.reshape(gt, 1, GH)                             # f32
    w2z = (w2p * zp[:, None, None]).reshape(gt, GH, O)         # z fold in f32
    w2z = jnp.pad(w2z, ((0, 0), (0, 0), (0, O_pad - O))).astype(compute_dtype)
    bias_out = jnp.sum(z_all[:, None] * b2_all, axis=0)        # [O] f32

    return {
        "table_main": table_main,                               # [total, H] f32
        "part_table": part_table,                               # [R, H] f32
        "pm_offsets": jnp.asarray(pm_offsets, jnp.int32),       # [P, 2]
        "feat_offsets": jnp.asarray(feat_offsets_np, jnp.int32),  # [F]
        "pair_b0": params["pair_b0"].astype(f32),               # [P, H]
        "w1bd": w1bd, "b1p": b1pk, "w2z": w2z, "bias_out": bias_out,
    }


# ---------------------------------------------------------------------------
# Forward (jit this; all shapes/dtypes derived from the packed arrays).
# ---------------------------------------------------------------------------
def dnamite_forward(packed, mains, pairs):
    B = mains.shape[0]
    H = packed["table_main"].shape[1]
    F = packed["feat_offsets"].shape[0]
    P = packed["pm_offsets"].shape[0]
    gt, GH, _ = packed["w2z"].shape
    gp = (gt * GH) // H
    O = packed["bias_out"].shape[0]
    compute_dtype = packed["w1bd"].dtype

    # layer 0 (folded into tables): mains are already post-ReLU
    h0_main = packed["table_main"][mains + packed["feat_offsets"][None, :]]  # [B,F,H]
    pair_rows = packed["pm_offsets"][None, :, :] + pairs                     # [B,P,2]
    parts = packed["part_table"][pair_rows]                                  # [B,P,2,H]
    h0_pair = jnp.maximum(parts.sum(axis=2) + packed["pair_b0"][None], 0.0)  # [B,P,H]

    h0 = jnp.concatenate([h0_main, h0_pair], axis=1)                         # [B,G,H]
    if gp != F + P:
        h0 = jnp.pad(h0, ((0, 0), (0, gp - (F + P)), (0, 0)))
    x = h0.reshape(B, gp * H).astype(compute_dtype)                          # lane-major

    out = _group_mlp_fused(x, packed["w1bd"], packed["b1p"], packed["w2z"])
    return out[:, :O] + packed["bias_out"][None, :]


# ---------------------------------------------------------------------------
# Pure-JAX reference (mirrors the PyTorch einsum semantics, f32).
# ---------------------------------------------------------------------------
def dnamite_forward_ref(params, mains, pairs, gamma=1.0):
    emb = params["embedding"]
    feat_offsets = params["feature_offsets"]
    pairs_list = params["pairs_list"]

    m = emb[mains + feat_offsets[None, :]]                                   # [B,F,E]
    m = jnp.maximum(jnp.einsum("ijk,jkl->ijl", m, params["main_w0"])
                    + params["main_b0"][None], 0.0)
    m = jnp.maximum(jnp.einsum("ijk,jkl->ijl", m, params["main_w1"])
                    + params["main_b1"][None], 0.0)
    m = jnp.einsum("ijk,jkl->ijl", m, params["main_w2"]) + params["main_b2"][None]
    out_main = jnp.einsum("ijk,j->ik", m, smooth_z(params["z_main"], gamma))

    p = emb[pairs + feat_offsets[pairs_list][None]]                          # [B,P,2,E]
    p = p.reshape(p.shape[0], p.shape[1], -1)                                # [B,P,2E]
    p = jnp.maximum(jnp.einsum("ijk,jkl->ijl", p, params["pair_w0"])
                    + params["pair_b0"][None], 0.0)
    p = jnp.maximum(jnp.einsum("ijk,jkl->ijl", p, params["pair_w1"])
                    + params["pair_b1"][None], 0.0)
    p = jnp.einsum("ijk,jkl->ijl", p, params["pair_w2"]) + params["pair_b2"][None]
    out_pairs = jnp.einsum("ijk,j->ik", p, smooth_z(params["z_pairs"], gamma))

    return out_main + out_pairs


# ---------------------------------------------------------------------------
# Deterministic synthetic parameter init (shapes from DNAMite.__init__).
# ---------------------------------------------------------------------------
def init_params(key, n_features, n_embed, n_hidden, n_output, feature_sizes,
                gamma=1.0):
    total = int(np.sum(feature_sizes))
    pairs_list = np.array(list(combinations(range(n_features), 2)), np.int32)
    n_pairs = pairs_list.shape[0]

    ks = jax.random.split(key, 16)

    def u(k, shape, bound):
        return jax.random.uniform(k, shape, jnp.float32, -bound, bound)

    return {
        "embedding": jax.random.normal(ks[0], (total, n_embed), jnp.float32),
        "feature_offsets": jnp.array(
            np.concatenate([[0], np.cumsum(feature_sizes)[:-1]]), jnp.int32),
        "pairs_list": jnp.array(pairs_list, jnp.int32),
        "main_w0": u(ks[1], (n_features, n_embed, n_hidden), 1.0 / np.sqrt(n_embed)),
        "main_b0": u(ks[2], (n_features, n_hidden), 1.0 / np.sqrt(n_embed)),
        "main_w1": u(ks[3], (n_features, n_hidden, n_hidden), 1.0 / np.sqrt(n_hidden)),
        "main_b1": u(ks[4], (n_features, n_hidden), 1.0 / np.sqrt(n_hidden)),
        "main_w2": u(ks[5], (n_features, n_hidden, n_output), 1.0 / np.sqrt(n_hidden)),
        "main_b2": u(ks[6], (n_features, n_output), 1.0 / np.sqrt(n_hidden)),
        "z_main": u(ks[7], (n_features,), gamma / 100.0),
        "pair_w0": u(ks[8], (n_pairs, 2 * n_embed, n_hidden), 1.0 / np.sqrt(2 * n_embed)),
        "pair_b0": u(ks[9], (n_pairs, n_hidden), 1.0 / np.sqrt(2 * n_embed)),
        "pair_w1": u(ks[10], (n_pairs, n_hidden, n_hidden), 1.0 / np.sqrt(n_hidden)),
        "pair_b1": u(ks[11], (n_pairs, n_hidden), 1.0 / np.sqrt(n_hidden)),
        "pair_w2": u(ks[12], (n_pairs, n_hidden, n_output), 1.0 / np.sqrt(n_hidden)),
        "pair_b2": u(ks[13], (n_pairs, n_output), 1.0 / np.sqrt(n_hidden)),
        "z_pairs": u(ks[14], (n_pairs,), gamma / 100.0),
    }


if __name__ == "__main__":
    n_features, n_embed, n_hidden, n_output = 4, 8, 16, 2
    feature_sizes = [8, 8, 8, 8]
    batch = 16
    n_pairs = n_features * (n_features - 1) // 2  # 6

    key = jax.random.PRNGKey(0)
    kp, km, kq = jax.random.split(key, 3)
    params = init_params(kp, n_features, n_embed, n_hidden, n_output,
                         feature_sizes)

    mains = jax.random.randint(km, (batch, n_features), 0, feature_sizes[0],
                               dtype=jnp.int32)
    pairs = jax.random.randint(kq, (batch, n_pairs, 2), 0, feature_sizes[0],
                               dtype=jnp.int32)

    ref = jax.block_until_ready(dnamite_forward_ref(params, mains, pairs))
    fwd = jax.jit(dnamite_forward)

    # Strict correctness check with an f32 packed parameter set.
    packed_f32 = prepare_dnamite_params(params, feature_sizes,
                                        compute_dtype=jnp.float32)
    out_f32 = jax.block_until_ready(fwd(packed_f32, mains, pairs))
    assert out_f32.shape == (batch, n_output)
    np.testing.assert_allclose(np.asarray(out_f32), np.asarray(ref),
                               rtol=1e-4, atol=1e-4)

    # Performance path: cached bf16 packed weights, f32 MXU accumulation.
    packed_bf16 = prepare_dnamite_params(params, feature_sizes,
                                         compute_dtype=jnp.bfloat16)
    out_bf16 = jax.block_until_ready(fwd(packed_bf16, mains, pairs))
    np.testing.assert_allclose(np.asarray(out_bf16), np.asarray(ref),
                               rtol=2e-2, atol=2e-2)

    print("KERNEL_OK")
</pallas_src>

<mosaic_0001>
module attributes {stable_mosaic.version = 11 : i64} {
  func.func @_packed_group_mlp_kernel(%arg0: i32, %arg1: i32, %arg2: memref<16x256xf32, #tpu.memory_space<vmem>>, %arg3: memref<1x256x256xf32, #tpu.memory_space<vmem>>, %arg4: memref<1x1x256xf32, #tpu.memory_space<vmem>>, %arg5: memref<1x256x128xf32, #tpu.memory_space<vmem>>, %arg6: memref<16x128xf32, #tpu.memory_space<vmem>>) attributes {dimension_semantics = [#tpu.dimension_semantics<parallel>, #tpu.dimension_semantics<arbitrary>], iteration_bounds = array<i64: 1, 1>, scalar_prefetch = 0 : i64, scratch_operands = 0 : i64, tpu.core_type = #tpu.core_type<tc>, window_params = [{transform_indices = @transform_0, window_bounds = array<i64: 16, 256>}, {transform_indices = @transform_1, window_bounds = array<i64: 1, 256, 256>}, {transform_indices = @transform_2, window_bounds = array<i64: 1, 1, 256>}, {transform_indices = @transform_3, window_bounds = array<i64: 1, 256, 128>}, {transform_indices = @transform_4, window_bounds = array<i64: 16, 128>}]} {
    %c0_i32 = arith.constant 0 : i32
    %0 = arith.cmpi eq, %arg1, %c0_i32 : i32
    %1 = arith.extui %0 : i1 to i32
    %c0_i32_0 = arith.constant 0 : i32
    %2 = arith.cmpi ne, %1, %c0_i32_0 : i32
    scf.if %2 {
      %cst_17 = arith.constant 0.000000e+00 : f32
      %19 = vector.broadcast %cst_17 : f32 to vector<16x128xf32>
      %c0_18 = arith.constant 0 : index
      %c0_19 = arith.constant 0 : index
      %20 = vector.load %arg6[%c0_18, %c0_19] : memref<16x128xf32, #tpu.memory_space<vmem>>, vector<16x128xf32>
      tpu.vector_store %arg6[%c0_18, %c0_19], %19 {strides = array<i32>} : memref<16x128xf32, #tpu.memory_space<vmem>>, vector<16x128xf32>,
    } else {
    }
    %c0 = arith.constant 0 : index
    %c0_1 = arith.constant 0 : index
    %3 = vector.load %arg2[%c0, %c0_1] : memref<16x256xf32, #tpu.memory_space<vmem>>, vector<16x256xf32>
    %c0_2 = arith.constant 0 : index
    %c0_3 = arith.constant 0 : index
    %c0_4 = arith.constant 0 : index
    %4 = vector.load %arg3[%c0_2, %c0_3, %c0_4] : memref<1x256x256xf32, #tpu.memory_space<vmem>>, vector<1x256x256xf32>
    %5 = vector.shape_cast %4 : vector<1x256x256xf32> to vector<256x256xf32>
    %cst = arith.constant dense<0.000000e+00> : vector<16x256xf32>
    %6 = tpu.matmul %3, %5, %cst {dimension_numbers = #tpu.dot_dimension_numbers<[1], [0], [0], [1], [0, 0, 1, 1], [], []>} : vector<16x256xf32>, vector<256x256xf32>, vector<16x256xf32> -> vector<16x256xf32>
    %c0_5 = arith.constant 0 : index
    %c0_6 = arith.constant 0 : index
    %c0_7 = arith.constant 0 : index
    %7 = vector.load %arg4[%c0_5, %c0_6, %c0_7] : memref<1x1x256xf32, #tpu.memory_space<vmem>>, vector<1x1x256xf32>
    %8 = vector.shape_cast %7 : vector<1x1x256xf32> to vector<1x256xf32>
    %9 = vector.broadcast %8 : vector<1x256xf32> to vector<16x256xf32>
    %10 = arith.addf %6, %9 : vector<16x256xf32>
    %cst_8 = arith.constant 0.000000e+00 : f32
    %11 = vector.broadcast %cst_8 : f32 to vector<16x256xf32>
    %12 = arith.maximumf %10, %11 : vector<16x256xf32>
    %c0_9 = arith.constant 0 : index
    %c0_10 = arith.constant 0 : index
    %13 = vector.load %arg6[%c0_9, %c0_10] : memref<16x128xf32, #tpu.memory_space<vmem>>, vector<16x128xf32>
    %c0_11 = arith.constant 0 : index
    %c0_12 = arith.constant 0 : index
    %c0_13 = arith.constant 0 : index
    %14 = vector.load %arg5[%c0_11, %c0_12, %c0_13] : memref<1x256x128xf32, #tpu.memory_space<vmem>>, vector<1x256x128xf32>
    %15 = vector.shape_cast %14 : vector<1x256x128xf32> to vector<256x128xf32>
    %cst_14 = arith.constant dense<0.000000e+00> : vector<16x128xf32>
    %16 = tpu.matmul %12, %15, %cst_14 {dimension_numbers = #tpu.dot_dimension_numbers<[1], [0], [0], [1], [0, 0, 1, 1], [], []>} : vector<16x256xf32>, vector<256x128xf32>, vector<16x128xf32> -> vector<16x128xf32>
    %17 = arith.addf %13, %16 : vector<16x128xf32>
    %c0_15 = arith.constant 0 : index
    %c0_16 = arith.constant 0 : index
    %18 = vector.load %arg6[%c0_15, %c0_16] : memref<16x128xf32, #tpu.memory_space<vmem>>, vector<16x128xf32>
    tpu.vector_store %arg6[%c0_15, %c0_16], %17 {strides = array<i32>} : memref<16x128xf32, #tpu.memory_space<vmem>>, vector<16x128xf32>,
    return
  }
  func.func @transform_0(%arg0: i32, %arg1: i32) -> (i32, i32) {
    %c0_i32 = arith.constant 0 : i32
    return %arg0, %arg1 : i32, i32
  }
  func.func @transform_1(%arg0: i32, %arg1: i32) -> (i32, i32, i32) {
    %c0_i32 = arith.constant 0 : i32
    %c0_i32_0 = arith.constant 0 : i32
    %c0_i32_1 = arith.constant 0 : i32
    return %arg1, %c0_i32, %c0_i32_0 : i32, i32, i32
  }
  func.func @transform_2(%arg0: i32, %arg1: i32) -> (i32, i32, i32) {
    %c0_i32 = arith.constant 0 : i32
    %c0_i32_0 = arith.constant 0 : i32
    %c0_i32_1 = arith.constant 0 : i32
    return %arg1, %c0_i32, %c0_i32_0 : i32, i32, i32
  }
  func.func @transform_3(%arg0: i32, %arg1: i32) -> (i32, i32, i32) {
    %c0_i32 = arith.constant 0 : i32
    %c0_i32_0 = arith.constant 0 : i32
    %c0_i32_1 = arith.constant 0 : i32
    return %arg1, %c0_i32, %c0_i32_0 : i32, i32, i32
  }
  func.func @transform_4(%arg0: i32, %arg1: i32) -> (i32, i32) {
    %c0_i32 = arith.constant 0 : i32
    %c0_i32_0 = arith.constant 0 : i32
    return %arg0, %c0_i32 : i32, i32
  }
}

</mosaic_0001>

<bundles_post_ra>
// kernel: dnamite_forward.1
= control target key start
LH: loop header
LB: loop body
LE: loop exit
PB: predicated region body
PF: predicated region fallthrough
CT: control target
= control target key end

     0   :  { %s770_s1 = inlined_call_operand.vmem [shape: f32[1,256,256], index: 1, kind: input, shape index: {}]   ;;  %s771_s0 = inlined_call_operand.vmem [shape: f32[16,256], index: 0, kind: input, shape index: {}]   ;;  %s772_s3 = inlined_call_operand.vmem [shape: f32[1,256,128], index: 3, kind: input, shape index: {}]   ;;  %s773_s2 = inlined_call_operand.vmem [shape: f32[1,1,256], index: 2, kind: input, shape index: {}]   ;;  %s774_s4 = inlined_call_operand.vmem [shape: f32[16,128], index: 4, kind: output, shape index: {}]  }
   0x1   :  { %v28_v0 = vld [vmem:[%s770_s1 + $0x8] sm:$0xff]  ;;  %v30_v1 = vld [vmem:[%s770_s1 + $0x18] sm:$0xff]  ;;  %v27_v2 = vld [vmem:[%s770_s1] sm:$0xff] }
   0x2   :  { %v339_v3 = vpack.c.bf16 %v30_v1, %v28_v0  ;;  %v29_v4 = vld [vmem:[%s770_s1 + $0x10] sm:$0xff]  ;;  %v32_v5 = vld [vmem:[%s770_s1 + $0x28] sm:$0xff]  ;;  %v34_v6 = vld [vmem:[%s770_s1 + $0x38] sm:$0xff] }
   0x3   :  { %v341_v7 = vpack.c.bf16 %v29_v4, %v27_v2  ;;  %v343_v8 = vpack.c.bf16 %v34_v6, %v32_v5  ;;  %v31_v9 = vld [vmem:[%s770_s1 + $0x20] sm:$0xff]  ;;  %v33_v10 = vld [vmem:[%s770_s1 + $0x30] sm:$0xff]  ;;  %v36_v11 = vld [vmem:[%s770_s1 + $0x48] sm:$0xff] }
   0x4   :  { %340 = vmatprep.subr.bf16.mxu0 %v339_v3  ;;  %v38_v12 = vld [vmem:[%s770_s1 + $0x58] sm:$0xff]  ;;  %v345_v13 = vpack.c.bf16 %v33_v10, %v31_v9  ;;  %v35_v15 = vld [vmem:[%s770_s1 + $0x40] sm:$0xff]  ;;  %v37_v16 = vld [vmem:[%s770_s1 + $0x50] sm:$0xff] }
   0x5   :  { %342 = vmatpush1.bf16.msra.mxu0 %v341_v7  ;;  %v347_v14 = vpack.c.bf16 %v38_v12, %v36_v11  ;;  %v40_v17 = vld [vmem:[%s770_s1 + $0x68] sm:$0xff]  ;;  %v42_v18 = vld [vmem:[%s770_s1 + $0x78] sm:$0xff]  ;;  %v349_v19 = vpack.c.bf16 %v37_v16, %v35_v15  ;;  %v39_v21 = vld [vmem:[%s770_s1 + $0x60] sm:$0xff] }
   0x6   :  { %344 = vmatprep.subr.bf16.mxu0 %v343_v8  ;;  %v351_v20 = vpack.c.bf16 %v42_v18, %v40_v17  ;;  %v41_v22 = vld [vmem:[%s770_s1 + $0x70] sm:$0xff]  ;;  %v44_v23 = vld [vmem:[%s770_s1 + $0x88] sm:$0xff]  ;;  %v46_v24 = vld [vmem:[%s770_s1 + $0x98] sm:$0xff] }
   0x7   :  { %v353_v25 = vpack.c.bf16 %v41_v22, %v39_v21  ;;  %v355_v26 = vpack.c.bf16 %v46_v24, %v44_v23  ;;  %v43_v27 = vld [vmem:[%s770_s1 + $0x80] sm:$0xff]  ;;  %v45_v28 = vld [vmem:[%s770_s1 + $0x90] sm:$0xff]  ;;  %v48_v29 = vld [vmem:[%s770_s1 + $0xa8] sm:$0xff] }
   0x8   :  { %v50_v30 = vld [vmem:[%s770_s1 + $0xb8] sm:$0xff]  ;;  %v357_v31 = vpack.c.bf16 %v45_v28, %v43_v27  ;;  %v47_v33 = vld [vmem:[%s770_s1 + $0xa0] sm:$0xff]  ;;  %v49_v34 = vld [vmem:[%s770_s1 + $0xb0] sm:$0xff] }
   0x9   :  { %346 = vmatpush1.bf16.msra.mxu0 %v345_v13  ;;  %v359_v32 = vpack.c.bf16 %v50_v30, %v48_v29  ;;  %v52_v35 = vld [vmem:[%s770_s1 + $0xc8] sm:$0xff]  ;;  %v54_v36 = vld [vmem:[%s770_s1 + $0xd8] sm:$0xff]  ;;  %v361_v37 = vpack.c.bf16 %v49_v34, %v47_v33  ;;  %v51_v39 = vld [vmem:[%s770_s1 + $0xc0] sm:$0xff] }
   0xa   :  { %348 = vmatprep.subr.bf16.mxu0 %v347_v14  ;;  %v363_v38 = vpack.c.bf16 %v54_v36, %v52_v35  ;;  %v53_v40 = vld [vmem:[%s770_s1 + $0xd0] sm:$0xff]  ;;  %v24_v41 = vld [vmem:[%s771_s0 + $0x8] sm:$0xff]  ;;  %v58_v43 = vld [vmem:[%s770_s1 + $0xf8] sm:$0xff] }
   0xb   :  { %v56_v42 = vld [vmem:[%s770_s1 + $0xe8] sm:$0xff]  ;;  %167 = vmatprep.mubr.f32.mxu0 %v24_v41  ;;  %v202_v44 = vld [vmem:[%s772_s3 + $0x80] sm:$0xff]  ;;  %v57_v46 = vld [vmem:[%s770_s1 + $0xf0] sm:$0xff]  ;;  %v365_v50 = vpack.c.bf16 %v53_v40, %v51_v39 }
   0xc   :  { %v55_v45 = vld [vmem:[%s770_s1 + $0xe0] sm:$0xff]  ;;  %v203_v47 = vld [vmem:[%s772_s3 + $0x88] sm:$0xff]  ;;  %v204_v53 = vld [vmem:[%s772_s3 + $0x90] sm:$0xff]  ;;  %v367_v56 = vpack.c.bf16 %v58_v43, %v56_v42 }
   0xd   :  { %350 = vmatpush1.bf16.msra.mxu0 %v349_v19  ;;  %v186_v48 = vld [vmem:[%s772_s3] sm:$0xff]  ;;  %v187_v49 = vld [vmem:[%s772_s3 + $0x8] sm:$0xff]  ;;  %v403_v51 = vpack.c.bf16 %v203_v47, %v202_v44  ;;  %v205_v54 = vld [vmem:[%s772_s3 + $0x98] sm:$0xff]  ;;  %v369_v0 = vpack.c.bf16 %v57_v46, %v55_v45 }
   0xe   :  { %352 = vmatprep.subr.bf16.mxu0 %v351_v20  ;;  %v405_v52 = vpack.c.bf16 %v187_v49, %v186_v48  ;;  %v188_v55 = vld [vmem:[%s772_s3 + $0x10] sm:$0xff]  ;;  %v407_v57 = vpack.c.bf16 %v205_v54, %v204_v53  ;;  %v189_v58 = vld [vmem:[%s772_s3 + $0x18] sm:$0xff]  ;;  %v206_v59 = vld [vmem:[%s772_s3 + $0xa0] sm:$0xff] }
   0xf   :  { %v207_v60 = vld [vmem:[%s772_s3 + $0xa8] sm:$0xff]  ;;  %v62_v62 = vld [vmem:[%s770_s1 + $0x118] sm:$0xff]  ;;  %404 = vmatprep.subr.bf16.mxu1 %v403_v51  ;;  %v409_v63 = vpack.c.bf16 %v189_v58, %v188_v55  ;;  %v59_v1 = vld [vmem:[%s770_s1 + $0x100] sm:$0xff] }
  0x10   :  { %v60_v61 = vld [vmem:[%s770_s1 + $0x108] sm:$0xff]  ;;  %406 = vmatpush3.bf16.msra.mxu1 %v405_v52  ;;  %v411_v2 = vpack.c.bf16 %v207_v60, %v206_v59  ;;  %v190_v3 = vld [vmem:[%s772_s3 + $0x20] sm:$0xff]  ;;  %v61_v6 = vld [vmem:[%s770_s1 + $0x110] sm:$0xff] }
  0x11   :  { %354 = vmatpush1.bf16.msra.mxu0 %v353_v25  ;;  %408 = vmatprep.subr.bf16.mxu1 %v407_v57  ;;  %v191_v4 = vld [vmem:[%s772_s3 + $0x28] sm:$0xff]  ;;  %v371_v5 = vpack.c.bf16 %v62_v62, %v60_v61  ;;  %v208_v7 = vld [vmem:[%s772_s3 + $0xb0] sm:$0xff]  ;;  %v209_v8 = vld [vmem:[%s772_s3 + $0xb8] sm:$0xff]  ;;  %v373_v12 = vpack.c.bf16 %v61_v6, %v59_v1 }
  0x12   :  { %356 = vmatprep.subr.bf16.mxu0 %v355_v26  ;;  %v64_v9 = vld [vmem:[%s770_s1 + $0x128] sm:$0xff]  ;;  %v66_v10 = vld [vmem:[%s770_s1 + $0x138] sm:$0xff]  ;;  %v413_v11 = vpack.c.bf16 %v191_v4, %v190_v3  ;;  %v63_v13 = vld [vmem:[%s770_s1 + $0x120] sm:$0xff]  ;;  %v415_v14 = vpack.c.bf16 %v209_v8, %v208_v7 }
  0x13   :  { %v192_v15 = vld [vmem:[%s772_s3 + $0x30] sm:$0xff]  ;;  %v193_v16 = vld [vmem:[%s772_s3 + $0x38] sm:$0xff]  ;;  %v375_v17 = vpack.c.bf16 %v66_v10, %v64_v9  ;;  %v210_v19 = vld [vmem:[%s772_s3 + $0xc0] sm:$0xff] }
  0x14   :  { %410 = vmatpush3.bf16.msra.mxu1 %v409_v63  ;;  %v65_v18 = vld [vmem:[%s770_s1 + $0x130] sm:$0xff]  ;;  %v211_v20 = vld [vmem:[%s772_s3 + $0xc8] sm:$0xff]  ;;  %v70_v22 = vld [vmem:[%s770_s1 + $0x158] sm:$0xff]  ;;  %v417_v23 = vpack.c.bf16 %v193_v16, %v192_v15 }
  0x15   :  { %358 = vmatpush1.bf16.msra.mxu0 %v357_v31  ;;  %412 = vmatprep.subr.bf16.mxu1 %v411_v2  ;;  %v68_v21 = vld [vmem:[%s770_s1 + $0x148] sm:$0xff]  ;;  %v377_v24 = vpack.c.bf16 %v65_v18, %v63_v13  ;;  %v67_v25 = vld [vmem:[%s770_s1 + $0x140] sm:$0xff]  ;;  %v419_v26 = vpack.c.bf16 %v211_v20, %v210_v19  ;;  %v69_v30 = vld [vmem:[%s770_s1 + $0x150] sm:$0xff]  ;;  %v93_v20 = vlaneseq }
  0x16   :  { %360 = vmatprep.subr.bf16.mxu0 %v359_v32  ;;  %v194_v27 = vld [vmem:[%s772_s3 + $0x40] sm:$0xff]  ;;  %v195_v28 = vld [vmem:[%s772_s3 + $0x48] sm:$0xff]  ;;  %v379_v29 = vpack.c.bf16 %v70_v22, %v68_v21  ;;  %v212_v31 = vld [vmem:[%s772_s3 + $0xd0] sm:$0xff]  ;;  %v381_v36 = vpack.c.bf16 %v69_v30, %v67_v25 }
  0x17   :  { %v213_v32 = vld [vmem:[%s772_s3 + $0xd8] sm:$0xff]  ;;  %v72_v33 = vld [vmem:[%s770_s1 + $0x168] sm:$0xff]  ;;  %v421_v35 = vpack.c.bf16 %v195_v28, %v194_v27  ;;  %v196_v39 = vld [vmem:[%s772_s3 + $0x50] sm:$0xff]  ;;  %v94_v21 = vshrl.u32 %v93_v20, 7 }
  0x18   :  { %414 = vmatpush3.bf16.msra.mxu1 %v413_v11  ;;  %v74_v34 = vld [vmem:[%s770_s1 + $0x178] sm:$0xff]  ;;  %v73_v42 = vld [vmem:[%s770_s1 + $0x170] sm:$0xff]  ;;  %v214_v43 = vld [vmem:[%s772_s3 + $0xe0] sm:$0xff] }
  0x19   :  { %362 = vmatpush1.bf16.msra.mxu0 %v361_v37  ;;  %416 = vmatprep.subr.bf16.mxu1 %v415_v14  ;;  %v71_v37 = vld [vmem:[%s770_s1 + $0x160] sm:$0xff]  ;;  %v197_v40 = vld [vmem:[%s772_s3 + $0x58] sm:$0xff]  ;;  %v383_v41 = vpack.c.bf16 %v74_v34, %v72_v33  ;;  %v215_v44 = vld [vmem:[%s772_s3 + $0xe8] sm:$0xff]  ;;  %v95_v22 = vsub.s32 0, %v94_v21 }
  0x1a   :  { %364 = vmatprep.subr.bf16.mxu0 %v363_v38  ;;  %v423_v38 = vpack.c.bf16 %v213_v32, %v212_v31  ;;  %v76_v45 = vld [vmem:[%s770_s1 + $0x188] sm:$0xff]  ;;  %v78_v46 = vld [vmem:[%s770_s1 + $0x198] sm:$0xff]  ;;  %v425_v47 = vpack.c.bf16 %v197_v40, %v196_v39  ;;  %v385_v48 = vpack.c.bf16 %v73_v42, %v71_v37  ;;  %v427_v49 = vpack.c.bf16 %v215_v44, %v214_v43  ;;  %v75_v51 = vld [vmem:[%s770_s1 + $0x180] sm:$0xff] }
  0x1b   :  { %v77_v52 = vld [vmem:[%s770_s1 + $0x190] sm:$0xff]  ;;  %v80_v53 = vld [vmem:[%s770_s1 + $0x1a8] sm:$0xff]  ;;  %v82_v54 = vld [vmem:[%s770_s1 + $0x1b8] sm:$0xff] }
  0x1c   :  { %418 = vmatpush3.bf16.msra.mxu1 %v417_v23  ;;  %v389_v55 = vpack.c.bf16 %v77_v52, %v75_v51  ;;  %v79_v57 = vld [vmem:[%s770_s1 + $0x1a0] sm:$0xff]  ;;  %v81_v58 = vld [vmem:[%s770_s1 + $0x1b0] sm:$0xff]  ;;  %v84_v59 = vld [vmem:[%s770_s1 + $0x1c8] sm:$0xff] }
  0x1d   :  { %366 = vmatpush1.bf16.msra.mxu0 %v365_v50  ;;  %420 = vmatprep.subr.bf16.mxu1 %v419_v26  ;;  %v387_v50 = vpack.c.bf16 %v78_v46, %v76_v45  ;;  %v86_v60 = vld [vmem:[%s770_s1 + $0x1d8] sm:$0xff]  ;;  %v393_v61 = vpack.c.bf16 %v81_v58, %v79_v57  ;;  %v83_v63 = vld [vmem:[%s770_s1 + $0x1c0] sm:$0xff]  ;;  %v88_v1 = vld [vmem:[%s770_s1 + $0x1e8] sm:$0xff] }
  0x1e   :  { %368 = vmatprep.subr.bf16.mxu0 %v367_v56  ;;  %v391_v56 = vpack.c.bf16 %v82_v54, %v80_v53  ;;  %v395_v62 = vpack.c.bf16 %v86_v60, %v84_v59  ;;  %v90_v2 = vld [vmem:[%s770_s1 + $0x1f8] sm:$0xff]  ;;  %v89_v6 = vld [vmem:[%s770_s1 + $0x1f0] sm:$0xff]  ;;  %v23_v8 = vld [vmem:[%s771_s0] sm:$0xff] }
  0x1f   :  { %v399_v4 = vpack.c.bf16 %v90_v2, %v88_v1  ;;  %v26_v9 = vld [vmem:[%s771_s0 + $0x18] sm:$0xff]  ;;  %v25_v10 = vld [vmem:[%s771_s0 + $0x10] sm:$0xff]  ;;  %v198_v11 = vld [vmem:[%s772_s3 + $0x60] sm:$0xff] }
  0x20   :  { %422 = vmatpush3.bf16.msra.mxu1 %v421_v35  ;;  %v216_v14 = vld [vmem:[%s772_s3 + $0xf0] sm:$0xff]  ;;  %v217_v15 = vld [vmem:[%s772_s3 + $0xf8] sm:$0xff]  ;;  %v91_v23 = vld [vmem:[%s773_s2] sm:$0x3] }
  0x21   :  { %370 = vmatpush1.bf16.msra.mxu0 %v369_v0  ;;  %424 = vmatprep.subr.bf16.mxu1 %v423_v38  ;;  %v85_v0 = vld [vmem:[%s770_s1 + $0x1d0] sm:$0xff]  ;;  %v431_v16 = vpack.c.bf16 %v217_v15, %v216_v14  ;;  %v201_v18 = vld [vmem:[%s772_s3 + $0x78] sm:$0xff]  ;;  %v96_v25 = vrot.slane %v91_v23, %v95_v22 }
  0x22   :  { %372 = vmatprep.subr.bf16.mxu0 %v371_v5  ;;  %v397_v3 = vpack.c.bf16 %v85_v0, %v83_v63  ;;  %v87_v5 = vld [vmem:[%s770_s1 + $0x1e0] sm:$0xff] }
  0x23   :  { %v401_v7 = vpack.c.bf16 %v89_v6, %v87_v5 }
  0x24   :  { %426 = vmatpush3.bf16.msra.mxu1 %v425_v47 }
  0x25   :  { %374 = vmatpush1.bf16.msra.mxu0 %v373_v12  ;;  %428 = vmatprep.subr.bf16.mxu1 %v427_v49  ;;  %v199_v12 = vld [vmem:[%s772_s3 + $0x68] sm:$0xff] }
  0x26   :  { %376 = vmatprep.subr.bf16.mxu0 %v375_v17  ;;  %v429_v13 = vpack.c.bf16 %v199_v12, %v198_v11  ;;  %v200_v17 = vld [vmem:[%s772_s3 + $0x70] sm:$0xff] }
  0x27   :  { %v433_v19 = vpack.c.bf16 %v201_v18, %v200_v17 }
  0x28   :  { %430 = vmatpush3.bf16.msra.mxu1 %v429_v13 }
  0x29   :  { %378 = vmatpush1.bf16.msra.mxu0 %v377_v24  ;;  %432 = vmatprep.subr.bf16.mxu1 %v431_v16  ;;  %v99_v24 = vsub.s32 1, %v94_v21 }
  0x2a   :  { %380 = vmatprep.subr.bf16.mxu0 %v379_v29 }
  0x2b   :  { %v100_v26 = vrot.slane %v91_v23, %v99_v24 }
  0x2c   :  { %434 = vmatpush3.bf16.msra.mxu1 %v433_v19 }
  0x2d   :  { %382 = vmatpush1.bf16.msra.mxu0 %v381_v36 }
  0x2e   :  { %384 = vmatprep.subr.bf16.mxu0 %v383_v41 }
  0x31   :  { %386 = vmatpush1.bf16.msra.mxu0 %v385_v48 }
  0x32   :  { %388 = vmatprep.subr.bf16.mxu0 %v387_v50 }
  0x35   :  { %390 = vmatpush1.bf16.msra.mxu0 %v389_v55 }
  0x36   :  { %392 = vmatprep.subr.bf16.mxu0 %v391_v56 }
  0x39   :  { %394 = vmatpush1.bf16.msra.mxu0 %v393_v61 }
  0x3a   :  { %396 = vmatprep.subr.bf16.mxu0 %v395_v62 }
  0x3d   :  { %398 = vmatpush1.bf16.msra.mxu0 %v397_v3 }
  0x3e   :  { %400 = vmatprep.subr.bf16.mxu0 %v399_v4 }
  0x41   :  { %402 = vmatpush1.bf16.msra.mxu0 %v401_v7 }
  0x44   :  { %168 = vmatmul.mubr.f32.vlgmr.msra.gmra.mrb[0].mxu0 %v23_v8 }
  0x45   :  { %173 = vmatprep.mubr.f32.mxu0 %v26_v9 }
  0x48   :  { %174 = vmatmul.mubr.f32.gmra.mrb[2].mxu0 %v25_v10 }
 0x117   :  { %v169_v27 = vpop.f32.mrb[0].mxu0 }
 0x118   :  { %v170_v28 = vadd.f32 %v169_v27, %v96_v25  ;;  %v171_v29 = vpop.f32.mrb[1].mxu0 }
 0x119   :  { %v172_v30 = vadd.f32 %v171_v29, %v100_v26 }
 0x11a   :  { %v180_v33 = vmax.f32 %v170_v28, 0.0 }
 0x11b   :  { %v175_v31 = vpop.f32.mrb[2].mxu0  ;;  %v181_v32 = vmax.f32 %v172_v30, 0.0 }
 0x11c   :  { %v176_v34 = vadd.f32 %v175_v31, %v96_v25  ;;  %v177_v35 = vpop.f32.mrb[3].mxu0 }
 0x11d   :  { %v178_v36 = vadd.f32 %v177_v35, %v100_v26  ;;  %282 = vmatprep.mubr.f32.mxu1 %v181_v32 }
 0x11e   :  { %283 = vmatmul.mubr.f32.vlgmr.msra.gmra.mrb[0].mxu1 %v180_v33  ;;  %v182_v38 = vmax.f32 %v176_v34, 0.0 }
 0x11f   :  { %v183_v37 = vmax.f32 %v178_v36, 0.0 }
 0x121   :  { %287 = vmatprep.mubr.f32.mxu1 %v183_v37 }
 0x122   :  { %288 = vmatmul.mubr.f32.gmra.mrb[2].mxu1 %v182_v38 }
 0x1f1   :  { %v333_v39 = vpop.f32.mrb[0].mxu1 }
 0x1f2   :  { %v334_v40 = vpop.f32.mrb[1].mxu1 }
 0x1f3   :  { %v335_v41 = vadd.f32 %v334_v40, %v333_v39 }
 0x1f5   :  { %v336_v42 = vpop.f32.mrb[2].mxu1  ;;  %295 = vst [vmem:[%s774_s4] sm:$0xff] %v335_v41 }
 0x1f6   :  { %v337_v43 = vpop.f32.mrb[3].mxu1 }
 0x1f7   :  { %v338_v44 = vadd.f32 %v337_v43, %v336_v42 }
 0x1f9   :  { %296 = vst [vmem:[%s774_s4 + $0x8] sm:$0xff] %v338_v44 }

</bundles_post_ra>
